<compile_context>
chip_gen: v7x
topology: tpu7x:2x2x1
jax: 0.10.0
libtpu: 0.0.40
codegen_flags: <defaults>
</compile_context>

<pallas_src>
import functools

import numpy as np
import jax
import jax.numpy as jnp
from jax import lax
from jax.experimental import pallas as pl
from jax.experimental.pallas import tpu as pltpu


def _attention_kernel(x_ref, w_qkv_ref, w_out_ref, b_out_ref, bias_ref, o_ref,
                      *, heads: int):
    """Whole-batch attention forward (single invocation, everything in VMEM).

    x_ref:     (B*N, C)    tokens of all batch elements (batch folded into rows)
    w_qkv_ref: (C, 3C)     qkv weight, stored (in, out); Q columns pre-scaled
    w_out_ref: (C, C)      output projection weight, stored (in, out)
    b_out_ref: (1, C)      output projection bias
    bias_ref:  (B*N, B*N)  additive mask: 0 same batch element, -1e30 otherwise
    o_ref:     (B*N, C)
    """
    bn, c = x_ref.shape
    hd = c // heads

    # One qkv projection over the whole batch-folded slab (single MXU matmul).
    qkv = jnp.dot(x_ref[...], w_qkv_ref[...],
                  preferred_element_type=jnp.float32)            # (BN, 3C)

    bias = bias_ref[...]                                         # hoisted
    w_out = w_out_ref[...]                                       # hoisted

    # Accumulate the output projection head by head:
    #   y = sum_h ctx_h @ W_out[h*hd:(h+1)*hd, :] + b
    acc = jnp.zeros((bn, c), jnp.float32)
    for h in range(heads):                                       # static unroll
        lo = h * hd
        # Lane-contiguous 2-D head slices (no (N, H, D) reshape / relayout).
        q_h = qkv[:, lo:lo + hd]                 # softmax scale pre-folded in W_q
        k_h = qkv[:, c + lo:c + lo + hd]
        v_h = qkv[:, 2 * c + lo:2 * c + lo + hd]

        # scores[i, j] = <q_i, k_j>; cross-batch entries killed by the bias add.
        s = lax.dot_general(q_h, k_h, (((1,), (1,)), ((), ())),
                            preferred_element_type=jnp.float32) + bias

        # Numerically stable, EXACT f32 softmax (the approximate EUP reciprocal
        # used previously was the source of the reference mismatch).
        m = jnp.max(s, axis=-1, keepdims=True)
        p = jnp.exp(s - m)
        attn = p / jnp.sum(p, axis=-1, keepdims=True)
        # attention_dropout (p = 0.0 default) -> identity at inference.

        ctx_h = jnp.dot(attn, v_h, preferred_element_type=jnp.float32)   # (BN, hd)
        acc = acc + jnp.dot(ctx_h, w_out[lo:lo + hd, :],
                            preferred_element_type=jnp.float32)

    # Output projection bias; proj_dropout (p = 0.0 default) -> identity.
    o_ref[...] = (acc + b_out_ref[...]).astype(o_ref.dtype)


def prepare_qkv_weight(w_qkv, dim):
    """One-time weight preparation: fold the module's 1/sqrt(dim) softmax scale
    into the Q columns of the qkv projection weight (stored (in, out))."""
    scale = 1.0 / dim ** 0.5
    return w_qkv.at[:, :dim].multiply(scale)


def _block_diag_bias(batch, seq):
    """Additive mask keeping attention within each batch element.  Built on the
    host with numpy from static shapes -> zero per-call runtime cost."""
    row = np.arange(batch * seq) // seq
    return jnp.asarray(
        np.where(row[:, None] == row[None, :], 0.0, -1e30).astype(np.float32))


def attention_forward(x, w_qkv_scaled, w_out, b_out, *, heads: int):
    """x: (B, N, C); w_qkv_scaled: (C, 3C) with Q columns pre-scaled
    (see prepare_qkv_weight); w_out: (C, C); b_out: (1, C)."""
    b, n, c = x.shape
    assert c % heads == 0
    bn = b * n
    hd = c // heads

    # Free (contiguous) reshape: fold batch into the token axis so the kernel
    # runs exactly once -- the whole problem (< 100 KiB) fits VMEM on every
    # generation, including v7x's 64 MiB.
    x2 = x.reshape(bn, c)
    bias = _block_diag_bias(b, n)

    kernel = functools.partial(_attention_kernel, heads=heads)

    flops = (2 * bn * c * 3 * c                   # qkv projection
             + heads * 2 * (2 * bn * bn * hd)     # scores + attn @ v
             + 2 * bn * c * c)                    # output projection
    transcendentals = heads * bn * bn             # exp
    bytes_accessed = 4 * (2 * bn * c + 3 * c * c + c * c + c + bn * bn)

    # No grid, no pipelining machinery: full arrays resident in VMEM.
    vmem = pl.BlockSpec(memory_space=pltpu.MemorySpace.VMEM)
    y2 = pl.pallas_call(
        kernel,
        out_shape=jax.ShapeDtypeStruct((bn, c), x.dtype),
        in_specs=[vmem, vmem, vmem, vmem, vmem],
        out_specs=vmem,
        cost_estimate=pl.CostEstimate(
            flops=flops,
            transcendentals=transcendentals,
            bytes_accessed=bytes_accessed,
        ),
    )(x2, w_qkv_scaled, w_out, b_out, bias)

    # Free reshape back to (B, N, C) -- layout plumbing only.
    return y2.reshape(b, n, c)


def _reference(x, w_qkv, w_out, b_out, heads):
    """Plain-JAX reference mirroring the PyTorch forward (unscaled w_qkv)."""
    b, n, c = x.shape
    hd = c // heads
    scale = 1.0 / c ** 0.5
    qkv = x @ w_qkv                                   # (B, N, 3C)
    qkv = qkv.reshape(b, n, 3, heads, hd)
    qkv = jnp.transpose(qkv, (2, 0, 3, 1, 4))         # (3, B, H, N, D)
    q, k, v = qkv[0], qkv[1], qkv[2]
    dot = jnp.einsum("bhid,bhjd->bhij", q, k) * scale
    attn = jax.nn.softmax(dot, axis=-1)
    out = jnp.einsum("bhij,bhjd->bhid", attn, v)      # (B, H, N, D)
    out = jnp.transpose(out, (0, 2, 1, 3)).reshape(b, n, c)
    return out @ w_out + b_out[0]


if __name__ == "__main__":
    # Small shapes consistent with the module: batch=2, seq=16, dim=32, heads=4.
    B, N, C, HEADS = 2, 16, 32, 4

    key = jax.random.PRNGKey(0)
    kx, kq, kw, kb = jax.random.split(key, 4)

    x = jax.random.normal(kx, (B, N, C), dtype=jnp.float32)
    # Module parameters stored (in, out) so the kernel computes x @ W
    # (equivalent to PyTorch's x @ W.T with W stored (out, in)).
    w_qkv = jax.random.normal(kq, (C, 3 * C), dtype=jnp.float32) * (1.0 / C ** 0.5)
    w_out = jax.random.normal(kw, (C, C), dtype=jnp.float32) * (1.0 / C ** 0.5)
    b_out = jax.random.normal(kb, (1, C), dtype=jnp.float32) * 0.02

    # One-time weight prep (outside the per-call path): fold the softmax scale.
    w_qkv_scaled = prepare_qkv_weight(w_qkv, C)

    y = attention_forward(x, w_qkv_scaled, w_out, b_out, heads=HEADS)
    y = jax.block_until_ready(y)

    y_ref = _reference(x, w_qkv, w_out, b_out, HEADS)
    assert y.shape == (B, N, C)
    # Kernel softmax is exact f32 now; the tolerance only has to cover MXU f32
    # matmul pass-decomposition rounding on real hardware.
    assert jnp.allclose(y, y_ref, atol=2e-3, rtol=2e-3), "mismatch vs reference"

    # attention_dropout / proj_dropout are identity at default p=0.0 (eval mode).
    print("KERNEL_OK")
</pallas_src>

<mosaic_0001>
module attributes {stable_mosaic.version = 11 : i64} {
  func.func @_attention_kernel(%arg0: memref<32x32xf32, #tpu.memory_space<vmem>>, %arg1: memref<32x96xf32, #tpu.memory_space<vmem>>, %arg2: memref<32x32xf32, #tpu.memory_space<vmem>>, %arg3: memref<1x32xf32, #tpu.memory_space<vmem>>, %arg4: memref<32x32xf32, #tpu.memory_space<vmem>>, %arg5: memref<32x32xf32, #tpu.memory_space<vmem>>) attributes {dimension_semantics = [], scalar_prefetch = 0 : i64, scratch_operands = 0 : i64, tpu.core_type = #tpu.core_type<tc>} {
    %c0 = arith.constant 0 : index
    %c0_0 = arith.constant 0 : index
    %0 = vector.load %arg0[%c0, %c0_0] : memref<32x32xf32, #tpu.memory_space<vmem>>, vector<32x32xf32>
    %c0_1 = arith.constant 0 : index
    %c0_2 = arith.constant 0 : index
    %1 = vector.load %arg1[%c0_1, %c0_2] : memref<32x96xf32, #tpu.memory_space<vmem>>, vector<32x96xf32>
    %cst = arith.constant dense<0.000000e+00> : vector<32x96xf32>
    %2 = tpu.matmul %0, %1, %cst {dimension_numbers = #tpu.dot_dimension_numbers<[1], [0], [0], [1], [0, 0, 1, 1], [], []>} : vector<32x32xf32>, vector<32x96xf32>, vector<32x96xf32> -> vector<32x96xf32>
    %c0_3 = arith.constant 0 : index
    %c0_4 = arith.constant 0 : index
    %3 = vector.load %arg4[%c0_3, %c0_4] : memref<32x32xf32, #tpu.memory_space<vmem>>, vector<32x32xf32>
    %c0_5 = arith.constant 0 : index
    %c0_6 = arith.constant 0 : index
    %4 = vector.load %arg2[%c0_5, %c0_6] : memref<32x32xf32, #tpu.memory_space<vmem>>, vector<32x32xf32>
    %cst_7 = arith.constant 0.000000e+00 : f32
    %5 = vector.broadcast %cst_7 : f32 to vector<32x32xf32>
    %6 = vector.extract_strided_slice %2 {offsets = [0, 0], sizes = [32, 8], strides = [1, 1]} : vector<32x96xf32> to vector<32x8xf32>
    %7 = vector.extract_strided_slice %2 {offsets = [0, 32], sizes = [32, 8], strides = [1, 1]} : vector<32x96xf32> to vector<32x8xf32>
    %8 = vector.extract_strided_slice %2 {offsets = [0, 64], sizes = [32, 8], strides = [1, 1]} : vector<32x96xf32> to vector<32x8xf32>
    %cst_8 = arith.constant dense<0.000000e+00> : vector<32x32xf32>
    %9 = tpu.matmul %6, %7, %cst_8 {dimension_numbers = #tpu.dot_dimension_numbers<[1], [1], [0], [0], [0, 0, 1, 0], [], []>} : vector<32x8xf32>, vector<32x8xf32>, vector<32x32xf32> -> vector<32x32xf32>
    %10 = arith.addf %9, %3 : vector<32x32xf32>
    %cst_9 = arith.constant dense<0xFF800000> : vector<32xf32>
    %11 = vector.multi_reduction <maximumf>, %10, %cst_9 [1] : vector<32x32xf32> to vector<32xf32>
    %12 = vector.shape_cast %11 : vector<32xf32> to vector<32x1xf32>
    %13 = vector.broadcast %12 : vector<32x1xf32> to vector<32x32xf32>
    %14 = arith.subf %10, %13 : vector<32x32xf32>
    %15 = math.exp %14 : vector<32x32xf32>
    %cst_10 = arith.constant dense<0.000000e+00> : vector<32xf32>
    %16 = vector.multi_reduction <add>, %15, %cst_10 [1] : vector<32x32xf32> to vector<32xf32>
    %17 = vector.shape_cast %16 : vector<32xf32> to vector<32x1xf32>
    %18 = vector.broadcast %17 : vector<32x1xf32> to vector<32x32xf32>
    %19 = arith.divf %15, %18 : vector<32x32xf32>
    %cst_11 = arith.constant dense<0.000000e+00> : vector<32x8xf32>
    %20 = tpu.matmul %19, %8, %cst_11 {dimension_numbers = #tpu.dot_dimension_numbers<[1], [0], [0], [1], [0, 0, 1, 1], [], []>} : vector<32x32xf32>, vector<32x8xf32>, vector<32x8xf32> -> vector<32x8xf32>
    %21 = vector.extract_strided_slice %4 {offsets = [0, 0], sizes = [8, 32], strides = [1, 1]} : vector<32x32xf32> to vector<8x32xf32>
    %cst_12 = arith.constant dense<0.000000e+00> : vector<32x32xf32>
    %22 = tpu.matmul %20, %21, %cst_12 {dimension_numbers = #tpu.dot_dimension_numbers<[1], [0], [0], [1], [0, 0, 1, 1], [], []>} : vector<32x8xf32>, vector<8x32xf32>, vector<32x32xf32> -> vector<32x32xf32>
    %23 = arith.addf %5, %22 : vector<32x32xf32>
    %24 = vector.extract_strided_slice %2 {offsets = [0, 8], sizes = [32, 8], strides = [1, 1]} : vector<32x96xf32> to vector<32x8xf32>
    %25 = vector.extract_strided_slice %2 {offsets = [0, 40], sizes = [32, 8], strides = [1, 1]} : vector<32x96xf32> to vector<32x8xf32>
    %26 = vector.extract_strided_slice %2 {offsets = [0, 72], sizes = [32, 8], strides = [1, 1]} : vector<32x96xf32> to vector<32x8xf32>
    %cst_13 = arith.constant dense<0.000000e+00> : vector<32x32xf32>
    %27 = tpu.matmul %24, %25, %cst_13 {dimension_numbers = #tpu.dot_dimension_numbers<[1], [1], [0], [0], [0, 0, 1, 0], [], []>} : vector<32x8xf32>, vector<32x8xf32>, vector<32x32xf32> -> vector<32x32xf32>
    %28 = arith.addf %27, %3 : vector<32x32xf32>
    %cst_14 = arith.constant dense<0xFF800000> : vector<32xf32>
    %29 = vector.multi_reduction <maximumf>, %28, %cst_14 [1] : vector<32x32xf32> to vector<32xf32>
    %30 = vector.shape_cast %29 : vector<32xf32> to vector<32x1xf32>
    %31 = vector.broadcast %30 : vector<32x1xf32> to vector<32x32xf32>
    %32 = arith.subf %28, %31 : vector<32x32xf32>
    %33 = math.exp %32 : vector<32x32xf32>
    %cst_15 = arith.constant dense<0.000000e+00> : vector<32xf32>
    %34 = vector.multi_reduction <add>, %33, %cst_15 [1] : vector<32x32xf32> to vector<32xf32>
    %35 = vector.shape_cast %34 : vector<32xf32> to vector<32x1xf32>
    %36 = vector.broadcast %35 : vector<32x1xf32> to vector<32x32xf32>
    %37 = arith.divf %33, %36 : vector<32x32xf32>
    %cst_16 = arith.constant dense<0.000000e+00> : vector<32x8xf32>
    %38 = tpu.matmul %37, %26, %cst_16 {dimension_numbers = #tpu.dot_dimension_numbers<[1], [0], [0], [1], [0, 0, 1, 1], [], []>} : vector<32x32xf32>, vector<32x8xf32>, vector<32x8xf32> -> vector<32x8xf32>
    %39 = vector.extract_strided_slice %4 {offsets = [8, 0], sizes = [8, 32], strides = [1, 1]} : vector<32x32xf32> to vector<8x32xf32>
    %cst_17 = arith.constant dense<0.000000e+00> : vector<32x32xf32>
    %40 = tpu.matmul %38, %39, %cst_17 {dimension_numbers = #tpu.dot_dimension_numbers<[1], [0], [0], [1], [0, 0, 1, 1], [], []>} : vector<32x8xf32>, vector<8x32xf32>, vector<32x32xf32> -> vector<32x32xf32>
    %41 = arith.addf %23, %40 : vector<32x32xf32>
    %42 = vector.extract_strided_slice %2 {offsets = [0, 16], sizes = [32, 8], strides = [1, 1]} : vector<32x96xf32> to vector<32x8xf32>
    %43 = vector.extract_strided_slice %2 {offsets = [0, 48], sizes = [32, 8], strides = [1, 1]} : vector<32x96xf32> to vector<32x8xf32>
    %44 = vector.extract_strided_slice %2 {offsets = [0, 80], sizes = [32, 8], strides = [1, 1]} : vector<32x96xf32> to vector<32x8xf32>
    %cst_18 = arith.constant dense<0.000000e+00> : vector<32x32xf32>
    %45 = tpu.matmul %42, %43, %cst_18 {dimension_numbers = #tpu.dot_dimension_numbers<[1], [1], [0], [0], [0, 0, 1, 0], [], []>} : vector<32x8xf32>, vector<32x8xf32>, vector<32x32xf32> -> vector<32x32xf32>
    %46 = arith.addf %45, %3 : vector<32x32xf32>
    %cst_19 = arith.constant dense<0xFF800000> : vector<32xf32>
    %47 = vector.multi_reduction <maximumf>, %46, %cst_19 [1] : vector<32x32xf32> to vector<32xf32>
    %48 = vector.shape_cast %47 : vector<32xf32> to vector<32x1xf32>
    %49 = vector.broadcast %48 : vector<32x1xf32> to vector<32x32xf32>
    %50 = arith.subf %46, %49 : vector<32x32xf32>
    %51 = math.exp %50 : vector<32x32xf32>
    %cst_20 = arith.constant dense<0.000000e+00> : vector<32xf32>
    %52 = vector.multi_reduction <add>, %51, %cst_20 [1] : vector<32x32xf32> to vector<32xf32>
    %53 = vector.shape_cast %52 : vector<32xf32> to vector<32x1xf32>
    %54 = vector.broadcast %53 : vector<32x1xf32> to vector<32x32xf32>
    %55 = arith.divf %51, %54 : vector<32x32xf32>
    %cst_21 = arith.constant dense<0.000000e+00> : vector<32x8xf32>
    %56 = tpu.matmul %55, %44, %cst_21 {dimension_numbers = #tpu.dot_dimension_numbers<[1], [0], [0], [1], [0, 0, 1, 1], [], []>} : vector<32x32xf32>, vector<32x8xf32>, vector<32x8xf32> -> vector<32x8xf32>
    %57 = vector.extract_strided_slice %4 {offsets = [16, 0], sizes = [8, 32], strides = [1, 1]} : vector<32x32xf32> to vector<8x32xf32>
    %cst_22 = arith.constant dense<0.000000e+00> : vector<32x32xf32>
    %58 = tpu.matmul %56, %57, %cst_22 {dimension_numbers = #tpu.dot_dimension_numbers<[1], [0], [0], [1], [0, 0, 1, 1], [], []>} : vector<32x8xf32>, vector<8x32xf32>, vector<32x32xf32> -> vector<32x32xf32>
    %59 = arith.addf %41, %58 : vector<32x32xf32>
    %60 = vector.extract_strided_slice %2 {offsets = [0, 24], sizes = [32, 8], strides = [1, 1]} : vector<32x96xf32> to vector<32x8xf32>
    %61 = vector.extract_strided_slice %2 {offsets = [0, 56], sizes = [32, 8], strides = [1, 1]} : vector<32x96xf32> to vector<32x8xf32>
    %62 = vector.extract_strided_slice %2 {offsets = [0, 88], sizes = [32, 8], strides = [1, 1]} : vector<32x96xf32> to vector<32x8xf32>
    %cst_23 = arith.constant dense<0.000000e+00> : vector<32x32xf32>
    %63 = tpu.matmul %60, %61, %cst_23 {dimension_numbers = #tpu.dot_dimension_numbers<[1], [1], [0], [0], [0, 0, 1, 0], [], []>} : vector<32x8xf32>, vector<32x8xf32>, vector<32x32xf32> -> vector<32x32xf32>
    %64 = arith.addf %63, %3 : vector<32x32xf32>
    %cst_24 = arith.constant dense<0xFF800000> : vector<32xf32>
    %65 = vector.multi_reduction <maximumf>, %64, %cst_24 [1] : vector<32x32xf32> to vector<32xf32>
    %66 = vector.shape_cast %65 : vector<32xf32> to vector<32x1xf32>
    %67 = vector.broadcast %66 : vector<32x1xf32> to vector<32x32xf32>
    %68 = arith.subf %64, %67 : vector<32x32xf32>
    %69 = math.exp %68 : vector<32x32xf32>
    %cst_25 = arith.constant dense<0.000000e+00> : vector<32xf32>
    %70 = vector.multi_reduction <add>, %69, %cst_25 [1] : vector<32x32xf32> to vector<32xf32>
    %71 = vector.shape_cast %70 : vector<32xf32> to vector<32x1xf32>
    %72 = vector.broadcast %71 : vector<32x1xf32> to vector<32x32xf32>
    %73 = arith.divf %69, %72 : vector<32x32xf32>
    %cst_26 = arith.constant dense<0.000000e+00> : vector<32x8xf32>
    %74 = tpu.matmul %73, %62, %cst_26 {dimension_numbers = #tpu.dot_dimension_numbers<[1], [0], [0], [1], [0, 0, 1, 1], [], []>} : vector<32x32xf32>, vector<32x8xf32>, vector<32x8xf32> -> vector<32x8xf32>
    %75 = vector.extract_strided_slice %4 {offsets = [24, 0], sizes = [8, 32], strides = [1, 1]} : vector<32x32xf32> to vector<8x32xf32>
    %cst_27 = arith.constant dense<0.000000e+00> : vector<32x32xf32>
    %76 = tpu.matmul %74, %75, %cst_27 {dimension_numbers = #tpu.dot_dimension_numbers<[1], [0], [0], [1], [0, 0, 1, 1], [], []>} : vector<32x8xf32>, vector<8x32xf32>, vector<32x32xf32> -> vector<32x32xf32>
    %77 = arith.addf %59, %76 : vector<32x32xf32>
    %c0_28 = arith.constant 0 : index
    %c0_29 = arith.constant 0 : index
    %78 = vector.load %arg3[%c0_28, %c0_29] : memref<1x32xf32, #tpu.memory_space<vmem>>, vector<1x32xf32>
    %79 = vector.broadcast %78 : vector<1x32xf32> to vector<32x32xf32>
    %80 = arith.addf %77, %79 : vector<32x32xf32>
    %c0_30 = arith.constant 0 : index
    %c0_31 = arith.constant 0 : index
    %81 = vector.load %arg5[%c0_30, %c0_31] : memref<32x32xf32, #tpu.memory_space<vmem>>, vector<32x32xf32>
    tpu.vector_store %arg5[%c0_30, %c0_31], %80 {strides = array<i32>} : memref<32x32xf32, #tpu.memory_space<vmem>>, vector<32x32xf32>,
    return
  }
}

</mosaic_0001>

<bundles_post_ra>
// kernel: tpu_custom_call.1
= control target key start
LH: loop header
LB: loop body
LE: loop exit
PB: predicated region body
PF: predicated region fallthrough
CT: control target
= control target key end

     0   :  { %10 = vsyncpa [#allocation3], 0  ;;  %s2796_s0 = inlined_call_operand.hbm [shape: f32[32,32], index: 0, kind: input, shape index: {}]   ;;  %s2797_s1 = inlined_call_operand.hbm [shape: f32[32,96], index: 1, kind: input, shape index: {}]   ;;  %s2798_s2 = inlined_call_operand.hbm [shape: f32[32,32], index: 2, kind: input, shape index: {}]   ;;  %s2799_s3 = inlined_call_operand.vmem [shape: f32[1,32], index: 3, kind: input, shape index: {}]   ;;  %s2800_s4 = inlined_call_operand.hbm [shape: f32[32,32], index: 4, kind: input, shape index: {}]   ;;  %s2801_s5 = inlined_call_operand.hbm [shape: f32[32,32], index: 5, kind: output, shape index: {}]  }
   0x1   :  { %11 = vsyncpa [#allocation6], 0 }
   0x2   :  { %12 = vsyncpa [#allocation9], 0 }
   0x3   :  { %13 = vsyncpa [#allocation4], 0  ;;  %s2400_s18 = smov [#allocation5]   ;;  %s2401_s20 = smov [#allocation2]  }
   0x4   :  { %s31_s19 = sshll.u32 %s2400_s18, 4  ;;  %s19_s21 = sshll.u32 %s2401_s20, 4  ;;  %s32_s19 = int_to_ptr.vmem [resolvable:$true] %s31_s19  ;;  %s2448_s21 = int_to_ptr.vmem [resolvable:$true] %s19_s21 }
   0x5   :  { %s2282_s24 = scalar_lea.hbm %s2797_s1, 512 }
   0x6   :  { %p2283_p0 = scmp.ne.s32.totalorder %s2797_s1, %s2282_s24  ;;  %p2286_p1 = scmp.lt.u32.totalorder %s2282_s24, %s2797_s1 }
   0x8   :  { %p2288_p2 = pnand %p2286_p1, %p2283_p0 }
   0xa   :  { %2291 = shalt.err (!%p2288_p2)
}
   0xb   :  { %s2292_s29 = scalar_lea.vmem %s32_s19, 512  ;;  %p2297_p4 = scmp.lt.s32.totalorder %s32_s19, %s32_s19 }
   0xc   :  { %p2293_p3 = scmp.ne.s32.totalorder %s32_s19, %s2292_s29  ;;  %p2298_p5 = scmp.lt.s32.totalorder %s2292_s29, %s2292_s29 }
   0xe   :  { %p2299_p6 = por %p2298_p5, %p2297_p4 }
  0x10   :  { %p2300_p7 = pnand %p2299_p6, %p2293_p3 }
  0x12   :  { %2303 = shalt.err (!%p2300_p7)
}
  0x13   :  { %s2402_s30 = smov 128   ;;  %s2403_s6 = smov 8  }
  0x14   :  { %37 = dma.hbm_to_vmem [thread:$0]  %s2797_s1, 512, %s32_s19, [#allocation6], %s2402_s30, %s2402_s30, %s2403_s6  }
  0x15   :  { %s2304_s11 = scalar_lea.hbm %s2796_s0, 512 }
  0x16   :  { %p2305_p8 = scmp.ne.s32.totalorder %s2796_s0, %s2304_s11  ;;  %p2308_p9 = scmp.lt.u32.totalorder %s2304_s11, %s2796_s0 }
  0x18   :  { %p2310_p10 = pnand %p2308_p9, %p2305_p8 }
  0x1a   :  { %2313 = shalt.err (!%p2310_p10)
}
  0x1b   :  { %s2314_s16 = scalar_lea.vmem %s2448_s21, 512  ;;  %p2319_p12 = scmp.lt.s32.totalorder %s2448_s21, %s2448_s21 }
  0x1c   :  { %p2315_p11 = scmp.ne.s32.totalorder %s2448_s21, %s2314_s16  ;;  %p2320_p13 = scmp.lt.s32.totalorder %s2314_s16, %s2314_s16 }
  0x1e   :  { %p2321_p0 = por %p2320_p13, %p2319_p12 }
  0x20   :  { %p2322_p1 = pnand %p2321_p0, %p2315_p11 }
  0x22   :  { %2325 = shalt.err (!%p2322_p1)
}
  0x23   :  { %25 = dma.hbm_to_vmem [thread:$0]  %s2796_s0, 512, %s2448_s21, [#allocation3], %s2402_s30, %s2402_s30, %s2403_s6  }
  0x24   :  { %s2404_s18 = smov [#allocation7]   ;;  %s2405_s20 = smov [#allocation8]  }
  0x25   :  { %s43_s19 = sshll.u32 %s2404_s18, 4  ;;  %s57_s22 = sshll.u32 %s2405_s20, 4  ;;  %s44_s19 = int_to_ptr.vmem [resolvable:$true] %s43_s19  ;;  %s2485_s22 = int_to_ptr.vmem [resolvable:$true] %s57_s22 }
  0x26   :  { %s2326_s25 = scalar_lea.hbm %s2798_s2, 512 }
  0x27   :  { %p2327_p2 = scmp.ne.s32.totalorder %s2798_s2, %s2326_s25  ;;  %p2330_p3 = scmp.lt.u32.totalorder %s2326_s25, %s2798_s2 }
  0x29   :  { %p2332_p4 = pnand %p2330_p3, %p2327_p2 }
  0x2b   :  { %2335 = shalt.err (!%p2332_p4)
}
  0x2c   :  { %s2336_s0 = scalar_lea.vmem %s44_s19, 512  ;;  %p2341_p6 = scmp.lt.s32.totalorder %s44_s19, %s44_s19 }
  0x2d   :  { %p2337_p5 = scmp.ne.s32.totalorder %s44_s19, %s2336_s0  ;;  %p2342_p7 = scmp.lt.s32.totalorder %s2336_s0, %s2336_s0 }
  0x2f   :  { %p2343_p8 = por %p2342_p7, %p2341_p6 }
  0x31   :  { %p2344_p9 = pnand %p2343_p8, %p2337_p5 }
  0x33   :  { %2347 = shalt.err (!%p2344_p9)
}
  0x34   :  { %49 = dma.hbm_to_vmem [thread:$0]  %s2798_s2, 512, %s44_s19, [#allocation6], %s2402_s30, %s2402_s30, %s2403_s6  }
  0x35   :  { %s2348_s10 = scalar_lea.hbm %s2800_s4, 512 }
  0x36   :  { %p2349_p10 = scmp.ne.s32.totalorder %s2800_s4, %s2348_s10  ;;  %p2352_p11 = scmp.lt.u32.totalorder %s2348_s10, %s2800_s4 }
  0x38   :  { %p2354_p12 = pnand %p2352_p11, %p2349_p10 }
  0x3a   :  { %2357 = shalt.err (!%p2354_p12)
}
  0x3b   :  { %s2358_s15 = scalar_lea.vmem %s2485_s22, 512  ;;  %p2363_p0 = scmp.lt.s32.totalorder %s2485_s22, %s2485_s22 }
  0x3c   :  { %p2359_p13 = scmp.ne.s32.totalorder %s2485_s22, %s2358_s15  ;;  %p2364_p1 = scmp.lt.s32.totalorder %s2358_s15, %s2358_s15 }
  0x3e   :  { %p2365_p2 = por %p2364_p1, %p2363_p0 }
  0x40   :  { %p2366_p3 = pnand %p2365_p2, %p2359_p13 }
  0x42   :  { %2369 = shalt.err (!%p2366_p3)
}
  0x43   :  { %63 = dma.hbm_to_vmem [thread:$0]  %s2800_s4, 512, %s2485_s22, [#allocation9], %s2402_s30, %s2402_s30, %s2403_s6  }
  0x44   :  { %2392 = dma.done.wait [#allocation3], 512  }
  0x45   :  { %2393 = vsyncadd [#allocation3], 4294966784 }
  0x46   :  { %2394 = dma.done.wait [#allocation6], 1024  }
  0x47   :  { %2395 = vsyncadd [#allocation6], 4294966272 }
  0x48   :  { %2396 = dma.done.wait [#allocation9], 512  }
  0x49   :  { %2397 = vsyncadd [#allocation9], 4294966784  ;;  %vm84_vm0 = vcmask 261120   ;;  %v80_v0 = vld [vmem:[#allocation5] sm:$0xff]  ;;  %v81_v1 = vld [vmem:[#allocation5 + $0x8] sm:$0xff]  ;;  %vm202_vm1 = vcmask 64512  }
  0x4a   :  { %v82_v2 = vld [vmem:[#allocation5 + $0x10] sm:$0xff]  ;;  %v2016_v3 = vpack.c.bf16 %v81_v1, %v80_v0  ;;  %v83_v4 = vld [vmem:[#allocation5 + $0x18] sm:$0xff]  ;;  %v76_v5 = vld [vmem:[#allocation2] sm:$0xff]  ;;  %s2406_s4 = smov 96   ;;  %s2407_s1 = smov 64  }
  0x4b   :  { %v2020_v6 = vpack.c.bf16 %v83_v4, %v82_v2  ;;  %1866 = vmatprep.mubr.msk.f32.mxu0 %vm84_vm0, %v76_v5  ;;  %v77_v7 = vld [vmem:[#allocation2 + $0x8] sm:$0xff]  ;;  %v78_v8 = vld [vmem:[#allocation2 + $0x10] sm:$0xff]  ;;  %v79_v9 = vld [vmem:[#allocation2 + $0x18] sm:$0xff]  ;;  %s2408_s17 = smov 88   ;;  %s2409_s18 = smov 120  }
  0x4c   :  { %2017 = vmatprep.subr.bf16.mxu0 %v2016_v3  ;;  %vm2548_vm2 = vmpackc.low %vm202_vm1, %vm202_vm1  ;;  %v2566_v25 = vld [vmem:[#allocation8 + $0x8] sm:$0xff]  ;;  %v2568_v27 = vld [vmem:[#allocation8] sm:$0xff]  ;;  %s2410_s19 = smov 80   ;;  %s2411_s20 = smov 112  }
  0x4d   :  { %2019 = vmatpush3.bf16.msra.mxu0 %v2016_v3  ;;  %v2573_v32 = vld [vmem:[#allocation8 + $0x10] sm:$0xff]  ;;  %v2575_v33 = vld [vmem:[#allocation8 + $0x18] sm:$0xff]  ;;  %s2412_s22 = smov 56   ;;  %s2413_s23 = smov 72  }
  0x4e   :  { %2021 = vmatprep.subr.bf16.mxu0 %v2020_v6  ;;  %s2414_s24 = smov 104   ;;  %s2415_s25 = smov 48  }
  0x4f   :  { %s2416_s26 = smov 40   ;;  %s2417_s29 = smov [#allocation10]  }
  0x50   :  { %s1683_s0 = sshll.u32 %s2417_s29, 4  ;;  %s1684_s0 = int_to_ptr.vmem [resolvable:$true] %s1683_s0 }
  0x51   :  { %2023 = vmatpush3.bf16.msra.mxu0 %v2020_v6  ;;  %p2375_p5 = scmp.lt.s32.totalorder %s1684_s0, %s1684_s0 }
  0x54   :  { %1867 = vmatmul.mubr.msk.f32.vlgmr.msra.gmra.mrb[0].mxu0 %vm84_vm0, %v77_v7 }
  0x55   :  { %1869 = vmatprep.mubr.msk.f32.mxu0 %vm84_vm0, %v78_v8 }
  0x58   :  { %1870 = vmatmul.mubr.msk.f32.gmra.mrb[2].mxu0 %vm84_vm0, %v79_v9 }
 0x127   :  { %v2526_v10 = vpop.f32.mrb[0].mxu0 }
 0x128   :  { %v2528_v11 = vpop.f32.mrb[1].mxu0 }
 0x129   :  { %1880 = vmatprep.mubr.msk.f32.mxu1 %vm202_vm1, %v2528_v11  ;;  %v2534_v12 = vpack.i.bf16 %v2526_v10, %v2528_v11 }
 0x12b   :  { %2139 = vrot.lane.b32.xlu0 %v2534_v12, %s2406_s4  ;;  %v2537_v13 = vpop.f32.mrb[2].mxu0 }
 0x12c   :  { %v2539_v14 = vpop.f32.mrb[3].mxu0 }
 0x12d   :  { %v2543_v15 = vpack.i.bf16 %v2537_v13, %v2539_v14 }
 0x12f   :  { %2144 = vrot.lane.b32.xlu0 %v2543_v15, %s2406_s4 }
 0x19d   :  { %v2140_v16 = vpop.permute.xlu0 %2139 }
 0x19e   :  { %v2142_v17 = vunpack.i.h.bf16 %v2140_v16  ;;  %v2141_v18 = vunpack.i.l.bf16 %v2140_v16 }
 0x1a0   :  { %v2024_v20 = vpack.c.bf16 %v2142_v17, %v2141_v18 }
 0x1a1   :  { %v2145_v21 = vpop.permute.xlu0 %2144 }
 0x1a2   :  { %2026 = vmatprep.subr.msk.bf16.mxu1 %vm2548_vm2, %v2024_v20  ;;  %v2147_v22 = vunpack.i.h.bf16 %v2145_v21  ;;  %v2146_v23 = vunpack.i.l.bf16 %v2145_v21 }
 0x1a3   :  { %2029 = vmatpush3.bf16.xpose.msk.msra.mxu1 %vm2548_vm2, %v2024_v20 }
 0x1a4   :  { %v2030_v24 = vpack.c.bf16 %v2147_v22, %v2146_v23 }
 0x1a6   :  { %2032 = vmatprep.subr.msk.bf16.mxu1 %vm2548_vm2, %v2030_v24 }
 0x1ab   :  { %2035 = vmatpush3.bf16.xpose.msk.msra.mxu1 %vm2548_vm2, %v2030_v24 }
 0x1b2   :  { %1881 = vmatmul.mubr.msk.f32.vlgmr.msra.gmra.mrb[0].mxu1 %vm202_vm1, %v2526_v10 }
 0x1b3   :  { %1883 = vmatprep.mubr.msk.f32.mxu1 %vm202_vm1, %v2539_v14 }
 0x1b6   :  { %1884 = vmatmul.mubr.msk.f32.gmra.mrb[2].mxu1 %vm202_vm1, %v2537_v13 }
 0x285   :  { %v1882_v26 = vpop.f32.mrb[0].mxu1 }
 0x286   :  { %v291_v28 = vadd.f32 %v1882_v26, %v2566_v25  ;;  %v285_v29 = vpop.f32.mrb[1].mxu1 }
 0x287   :  { %v286_v30 = vadd.f32 %v285_v29, %v2568_v27 }
 0x288   :  { %v307_v31 = vsel %vm84_vm0, %v291_v28, -inf }
 0x289   :  { %308 = vmax.xlane.f32.xlu1 %v307_v31  ;;  %v1885_v34 = vpop.f32.mrb[2].mxu1  ;;  %v304_v38 = vsel %vm84_vm0, %v286_v30, -inf }
 0x28a   :  { %v295_v35 = vpop.f32.mrb[3].mxu1  ;;  %v301_v37 = vadd.f32 %v1885_v34, %v2575_v33 }
 0x28b   :  { %v296_v36 = vadd.f32 %v295_v35, %v2573_v32 }
 0x28c   :  { %v313_v40 = vsel %vm84_vm0, %v301_v37, -inf }
 0x28d   :  { %305 = vmax.xlane.f32.xlu1 %v304_v38  ;;  %v310_v39 = vsel %vm84_vm0, %v296_v36, -inf }
 0x28e   :  { %311 = vmax.xlane.f32.xlu0 %v310_v39 }
 0x291   :  { %314 = vmax.xlane.f32.xlu1 %v313_v40 }
 0x2a2   :  { %2149 = vrot.lane.b32.xlu1 %v2534_v12, %s2407_s1 }
 0x2a4   :  { %2154 = vrot.lane.b32.xlu0 %v2543_v15, %s2407_s1 }
 0x2a6   :  { %2159 = vrot.lane.b32.xlu1 %v2534_v12, %s2408_s17 }
 0x2a8   :  { %461 = vrot.lane.b32.xlu0 %v2539_v14, %s2409_s18 }
 0x2aa   :  { %2164 = vrot.lane.b32.xlu1 %v2543_v15, %s2408_s17 }
 0x2ac   :  { %2169 = vrot.lane.b32.xlu0 %v2534_v12, %s2410_s19 }
 0x2ae   :  { %457 = vrot.lane.b32.xlu1 %v2528_v11, %s2409_s18 }
 0x2b0   :  { %921 = vrot.lane.b32.xlu0 %v2528_v11, %s2411_s20 }
 0x2b4   :  { %925 = vrot.lane.b32.xlu0 %v2539_v14, %s2411_s20 }
 0x316   :  { %v309_v41 = vpop.xlane.xlu1 %308 }
 0x317   :  { %v317_v42 = vsub.f32 %v291_v28, %v309_v41 }
 0x319   :  { %v322_v43 = vmul.f32 1.442695, %v317_v42 }
 0x31a   :  { %v306_v44 = vpop.xlane.xlu1 %305 }
 0x31b   :  { %2218 = vpow2.f32 %v322_v43  ;;  %v316_v45 = vsub.f32 %v286_v30, %v306_v44  ;;  %v312_v46 = vpop.xlane.xlu0 %311 }
 0x31c   :  { %v318_v2 = vsub.f32 %v296_v36, %v312_v46 }
 0x31d   :  { %v320_v47 = vmul.f32 1.442695, %v316_v45 }
 0x31e   :  { %v315_v48 = vpop.xlane.xlu1 %314  ;;  %v324_v4 = vmul.f32 1.442695, %v318_v2 }
 0x31f   :  { %2220 = vpow2.f32 %v320_v47  ;;  %v2155_v49 = vpop.permute.xlu0 %2154  ;;  %v319_v1 = vsub.f32 %v301_v37, %v315_v48 }
 0x320   :  { %v2157_v51 = vunpack.i.h.bf16 %v2155_v49  ;;  %v2156_v52 = vunpack.i.l.bf16 %v2155_v49 }
 0x321   :  { %v326_v3 = vmul.f32 1.442695, %v319_v1 }
 0x322   :  { %v2150_v50 = vpop.permute.xlu1 %2149  ;;  %v2040_v59 = vpack.c.bf16 %v2157_v51, %v2156_v52 }
 0x323   :  { %v2152_v53 = vunpack.i.h.bf16 %v2150_v50  ;;  %v2151_v54 = vunpack.i.l.bf16 %v2150_v50  ;;  %2222 = vpow2.f32 %v326_v3  ;;  %v462_v21 = vpop.permute.xlu0 %461 }
 0x324   :  { %2224 = vpow2.f32 %v324_v4 }
 0x325   :  { %v2219_v55 = vpop.eup %2218  ;;  %v2036_v56 = vpack.c.bf16 %v2152_v53, %v2151_v54 }
 0x326   :  { %v2160_v57 = vpop.permute.xlu1 %2159  ;;  %v331_v58 = vsel %vm84_vm0, %v2219_v55, 0.0 }
 0x327   :  { %v2162_v60 = vunpack.i.h.bf16 %v2160_v57  ;;  %v2161_v61 = vunpack.i.l.bf16 %v2160_v57  ;;  %332 = vadd.xlane.f32.xlu1 %v331_v58  ;;  %2037 = vmatprep.subr.bf16.mxu0 %v2036_v56  ;;  %v2170_v30 = vpop.permute.xlu0 %2169 }
 0x328   :  { %2039 = vmatpush3.bf16.msra.mxu0 %v2036_v56  ;;  %v2172_v31 = vunpack.i.h.bf16 %v2170_v30  ;;  %v2171_v34 = vunpack.i.l.bf16 %v2170_v30 }
 0x329   :  { %v2221_v62 = vpop.eup %2220  ;;  %2041 = vmatprep.subr.bf16.mxu0 %v2040_v59  ;;  %v2044_v0 = vpack.c.bf16 %v2162_v60, %v2161_v61 }
 0x32a   :  { %v328_v63 = vsel %vm84_vm0, %v2221_v62, 0.0  ;;  %v2165_v9 = vpop.permute.xlu1 %2164  ;;  %v2064_v35 = vpack.c.bf16 %v2172_v31, %v2171_v34 }
 0x32b   :  { %329 = vadd.xlane.f32.xlu1 %v328_v63  ;;  %v2167_v23 = vunpack.i.h.bf16 %v2165_v9  ;;  %v2166_v24 = vunpack.i.l.bf16 %v2165_v9  ;;  %v922_v48 = vpop.permute.xlu0 %921 }
 0x32c   :  { %2043 = vmatpush3.bf16.msra.mxu0 %v2040_v59 }
 0x32d   :  { %2046 = vmatprep.subr.msk.bf16.mxu0 %vm2548_vm2, %v2044_v0  ;;  %v2223_v5 = vpop.eup %2222  ;;  %v2050_v29 = vpack.c.bf16 %v2167_v23, %v2166_v24 }
 0x32e   :  { %v337_v6 = vsel %vm84_vm0, %v2223_v5, 0.0  ;;  %v2225_v7 = vpop.eup %2224  ;;  %v458_v16 = vpop.permute.xlu1 %457 }
 0x32f   :  { %v334_v8 = vsel %vm84_vm0, %v2225_v7, 0.0  ;;  %v926_v50 = vpop.permute.xlu0 %925 }
 0x33c   :  { %459 = vrot.lane.b32.xlu1 %v2526_v10, %s2409_s18 }
 0x360   :  { %338 = vadd.xlane.f32.xlu1 %v337_v6 }
 0x364   :  { %335 = vadd.xlane.f32.xlu1 %v334_v8 }
 0x375   :  { %463 = vrot.lane.b32.xlu1 %v2537_v13, %s2409_s18 }
 0x379   :  { %2174 = vrot.lane.b32.xlu1 %v2543_v15, %s2410_s19 }
 0x37d   :  { %923 = vrot.lane.b32.xlu1 %v2526_v10, %s2411_s20 }
 0x381   :  { %927 = vrot.lane.b32.xlu1 %v2537_v13, %s2411_s20 }
 0x3b4   :  { %v333_v17 = vpop.xlane.xlu1 %332 }
 0x3b5   :  { %2226 = vrcp.f32 %v333_v17 }
 0x3b8   :  { %v330_v18 = vpop.xlane.xlu1 %329 }
 0x3b9   :  { %2228 = vrcp.f32 %v330_v18 }
 0x3bc   :  { %v460_v36 = vpop.permute.xlu1 %459 }
 0x3bf   :  { %v2227_v20 = vpop.eup %2226 }
 0x3c0   :  { %v343_v28 = vmul.f32 %v2227_v20, %v2219_v55 }
 0x3c3   :  { %v2229_v22 = vpop.eup %2228 }
 0x3c4   :  { %v341_v26 = vmul.f32 %v2229_v22, %v2221_v62 }
 0x3c6   :  { %1894 = vmatprep.mubr.msk.f32.mxu0 %vm84_vm0, %v341_v26 }
 0x3c7   :  { %1895 = vmatmul.mubr.msk.f32.vlgmr.msra.gmra.mrb[4].mxu0 %vm84_vm0, %v343_v28 }
 0x3c8   :  { %2049 = vmatpush3.bf16.xpose.msk.msra.mxu0 %vm2548_vm2, %v2044_v0 }
 0x3c9   :  { %2052 = vmatprep.subr.msk.bf16.mxu0 %vm2548_vm2, %v2050_v29 }
 0x3d0   :  { %2055 = vmatpush3.bf16.xpose.msk.msra.mxu0 %vm2548_vm2, %v2050_v29 }
 0x3d1   :  { %2066 = vmatprep.subr.msk.bf16.mxu0 %vm2548_vm2, %v2064_v35 }
 0x3ed   :  { %v339_v37 = vpop.xlane.xlu1 %338 }
 0x3ee   :  { %2230 = vrcp.f32 %v339_v37 }
 0x3f1   :  { %v336_v38 = vpop.xlane.xlu1 %335 }
 0x3f2   :  { %2232 = vrcp.f32 %v336_v38 }
 0x3f5   :  { %v464_v39 = vpop.permute.xlu1 %463 }
 0x3f8   :  { %v2231_v40 = vpop.eup %2230 }
 0x3f9   :  { %v2175_v42 = vpop.permute.xlu1 %2174  ;;  %v347_v44 = vmul.f32 %v2231_v40, %v2223_v5 }
 0x3fa   :  { %v2177_v45 = vunpack.i.h.bf16 %v2175_v42  ;;  %v2176_v46 = vunpack.i.l.bf16 %v2175_v42 }
 0x3fc   :  { %v2233_v41 = vpop.eup %2232  ;;  %v2070_v47 = vpack.c.bf16 %v2177_v45, %v2176_v46 }
 0x3fd   :  { %v345_v43 = vmul.f32 %v2233_v41, %v2225_v7  ;;  %v924_v49 = vpop.permute.xlu1 %923 }
 0x3ff   :  { %1897 = vmatprep.mubr.msk.f32.mxu0 %vm84_vm0, %v345_v43 }
 0x400   :  { %1898 = vmatmul.mubr.msk.f32.gmra.mrb[6].mxu0 %vm84_vm0, %v347_v44 }
 0x401   :  { %1908 = vmatprep.mubr.msk.f32.mxu0 %vm202_vm1, %v458_v16  ;;  %v928_v51 = vpop.permute.xlu1 %927 }
 0x404   :  { %1909 = vmatmul.mubr.msk.f32.vlgmr.msra.gmra.mrb[8].mxu0 %vm202_vm1, %v460_v36 }
 0x405   :  { %2069 = vmatpush3.bf16.xpose.msk.msra.mxu0 %vm2548_vm2, %v2064_v35  ;;  %1911 = vmatprep.mubr.msk.f32.mxu0 %vm202_vm1, %v462_v21 }
 0x406   :  { %2072 = vmatprep.subr.msk.bf16.mxu0 %vm2548_vm2, %v2070_v47 }
 0x408   :  { %1912 = vmatmul.mubr.msk.f32.gmra.mrb[10].mxu0 %vm202_vm1, %v464_v39 }
 0x409   :  { %1952 = vmatprep.mubr.msk.f32.mxu0 %vm202_vm1, %v922_v48 }
 0x40d   :  { %2075 = vmatpush3.bf16.xpose.msk.msra.mxu0 %vm2548_vm2, %v2070_v47 }
 0x414   :  { %1953 = vmatmul.mubr.msk.f32.vlgmr.msra.gmra.mrb[12].mxu0 %vm202_vm1, %v924_v49 }
 0x415   :  { %1955 = vmatprep.mubr.msk.f32.mxu0 %vm202_vm1, %v926_v50 }
 0x418   :  { %1956 = vmatmul.mubr.msk.f32.gmra.mrb[14].mxu0 %vm202_vm1, %v928_v51 }
 0x49a   :  { %v2638_v52 = vpop.f32.mrb[4].mxu0 }
 0x49b   :  { %v2640_v53 = vpop.f32.mrb[5].mxu0 }
 0x4d3   :  { %v2642_v54 = vpop.f32.mrb[6].mxu0 }
 0x4d4   :  { %v2644_v55 = vpop.f32.mrb[7].mxu0 }
 0x4d7   :  { %v1910_v56 = vpop.f32.mrb[8].mxu0 }
 0x4d8   :  { %v561_v57 = vadd.f32 %v1910_v56, %v2566_v25  ;;  %v555_v58 = vpop.f32.mrb[9].mxu0 }
 0x4d9   :  { %v556_v59 = vadd.f32 %v555_v58, %v2568_v27 }
 0x4da   :  { %v577_v60 = vsel %vm84_vm0, %v561_v57, -inf }
 0x4db   :  { %578 = vmax.xlane.f32.xlu1 %v577_v60  ;;  %v1913_v61 = vpop.f32.mrb[10].mxu0  ;;  %v574_v62 = vsel %vm84_vm0, %v556_v59, -inf }
 0x4dc   :  { %v565_v63 = vpop.f32.mrb[11].mxu0  ;;  %575 = vmax.xlane.f32.xlu0 %v574_v62  ;;  %v571_v1 = vadd.f32 %v1913_v61, %v2575_v33 }
 0x4dd   :  { %v566_v0 = vadd.f32 %v565_v63, %v2573_v32 }
 0x4de   :  { %v583_v3 = vsel %vm84_vm0, %v571_v1, -inf }
 0x4df   :  { %v580_v2 = vsel %vm84_vm0, %v566_v0, -inf }
 0x4e0   :  { %581 = vmax.xlane.f32.xlu0 %v580_v2 }
 0x4e4   :  { %584 = vmax.xlane.f32.xlu0 %v583_v3 }
 0x4e7   :  { %v1954_v4 = vpop.f32.mrb[12].mxu0 }
 0x4e8   :  { %v1019_v5 = vpop.f32.mrb[13].mxu0  ;;  %v2679_v40 = vadd.f32 %v1954_v4, %v2566_v25 }
 0x4e9   :  { %v2676_v39 = vadd.f32 %v1019_v5, %v2568_v27 }
 0x4eb   :  { %v1957_v6 = vpop.f32.mrb[14].mxu0  ;;  %v1038_v42 = vsel %vm84_vm0, %v2676_v39, -inf }
 0x4ec   :  { %v1029_v7 = vpop.f32.mrb[15].mxu0 }
 0x4ed   :  { %v2682_v41 = vadd.f32 %v1029_v7, %v2573_v32 }
 0x568   :  { %v579_v8 = vpop.xlane.xlu1 %578 }
 0x569   :  { %v587_v9 = vsub.f32 %v561_v57, %v579_v8  ;;  %v576_v16 = vpop.xlane.xlu0 %575 }
 0x56a   :  { %v586_v17 = vsub.f32 %v556_v59, %v576_v16 }
 0x56b   :  { %v592_v18 = vmul.f32 1.442695, %v587_v9 }
 0x56c   :  { %v590_v20 = vmul.f32 1.442695, %v586_v17 }
 0x56d   :  { %2234 = vpow2.f32 %v592_v18  ;;  %v582_v21 = vpop.xlane.xlu0 %581 }
 0x56e   :  { %2236 = vpow2.f32 %v590_v20  ;;  %v588_v22 = vsub.f32 %v566_v0, %v582_v21 }
 0x570   :  { %v594_v23 = vmul.f32 1.442695, %v588_v22 }
 0x571   :  { %v585_v24 = vpop.xlane.xlu0 %584 }
 0x572   :  { %2238 = vpow2.f32 %v594_v23  ;;  %v589_v26 = vsub.f32 %v571_v1, %v585_v24 }
 0x574   :  { %v596_v28 = vmul.f32 1.442695, %v589_v26 }
 0x576   :  { %2240 = vpow2.f32 %v596_v28 }
 0x577   :  { %v2654_v29 = vpop.eup %2234 }
 0x578   :  { %v2237_v30 = vpop.eup %2236  ;;  %v601_v31 = vsel %vm84_vm0, %v2654_v29, 0.0 }
 0x579   :  { %602 = vadd.xlane.f32.xlu0 %v601_v31  ;;  %v598_v34 = vsel %vm84_vm0, %v2237_v30, 0.0 }
 0x57a   :  { %599 = vadd.xlane.f32.xlu1 %v598_v34 }
 0x57c   :  { %v2659_v35 = vpop.eup %2238 }
 0x57d   :  { %v604_v36 = vsel %vm84_vm0, %v2659_v35, 0.0 }
 0x57e   :  { %605 = vadd.xlane.f32.xlu1 %v604_v36 }
 0x580   :  { %v2663_v37 = vpop.eup %2240 }
 0x581   :  { %v607_v38 = vsel %vm84_vm0, %v2663_v37, 0.0 }
 0x582   :  { %608 = vadd.xlane.f32.xlu0 %v607_v38 }
 0x58f   :  { %2179 = vrot.lane.b32.xlu1 %v2534_v12, %s2412_s22 }
 0x593   :  { %2189 = vrot.lane.b32.xlu1 %v2534_v12, %s2413_s23 }
 0x597   :  { %2194 = vrot.lane.b32.xlu1 %v2543_v15, %s2413_s23 }
 0x598   :  { %2184 = vrot.lane.b32.xlu0 %v2543_v15, %s2412_s22 }
 0x59b   :  { %1294 = vrot.lane.b32.xlu1 %v2526_v10, %s2414_s24  ;;  %v2687_v10 = vadd.f32 %v1957_v6, %v2575_v33 }
 0x59c   :  { %1292 = vrot.lane.b32.xlu0 %v2528_v11, %s2414_s24  ;;  %v1041_v11 = vsel %vm84_vm0, %v2679_v40, -inf }
 0x59f   :  { %1298 = vrot.lane.b32.xlu1 %v2537_v13, %s2414_s24  ;;  %v1044_v13 = vsel %vm84_vm0, %v2682_v41, -inf }
 0x5a0   :  { %1296 = vrot.lane.b32.xlu0 %v2539_v14, %s2414_s24  ;;  %v1047_v14 = vsel %vm84_vm0, %v2687_v10, -inf }
 0x5bf   :  { %1039 = vmax.xlane.f32.xlu0 %v1038_v42 }
 0x5c3   :  { %1042 = vmax.xlane.f32.xlu1 %v1041_v11  ;;  %1045 = vmax.xlane.f32.xlu0 %v1044_v13  ;;  %v187_v13 = vld [vmem:[#allocation7 + $0x8] sm:$0xff] }
 0x5c7   :  { %1048 = vmax.xlane.f32.xlu0 %v1047_v14  ;;  %v186_v14 = vld [vmem:[#allocation7] sm:$0xff] }
 0x606   :  { %v603_v44 = vpop.xlane.xlu0 %602 }
 0x607   :  { %v600_v43 = vpop.xlane.xlu1 %599 }
 0x608   :  { %2242 = vrcp.f32 %v600_v43 }
 0x609   :  { %2244 = vrcp.f32 %v603_v44 }
 0x60b   :  { %v606_v45 = vpop.xlane.xlu1 %605 }
 0x60c   :  { %2246 = vrcp.f32 %v606_v45 }
 0x60f   :  { %v2180_v46 = vpop.permute.xlu1 %2179  ;;  %v609_v47 = vpop.xlane.xlu0 %608 }
 0x610   :  { %v2182_v48 = vunpack.i.h.bf16 %v2180_v46  ;;  %v2181_v49 = vunpack.i.l.bf16 %v2180_v46  ;;  %2248 = vrcp.f32 %v609_v47 }
 0x612   :  { %v2243_v50 = vpop.eup %2242  ;;  %v2056_v51 = vpack.c.bf16 %v2182_v48, %v2181_v49 }
 0x613   :  { %v2190_v56 = vpop.permute.xlu1 %2189  ;;  %v2185_v57 = vpop.permute.xlu0 %2184  ;;  %v611_v58 = vmul.f32 %v2243_v50, %v2237_v30 }
 0x614   :  { %v2192_v59 = vunpack.i.h.bf16 %v2190_v56  ;;  %v2191_v60 = vunpack.i.l.bf16 %v2190_v56  ;;  %v2187_v61 = vunpack.i.h.bf16 %v2185_v57  ;;  %v2186_v62 = vunpack.i.l.bf16 %v2185_v57  ;;  %2057 = vmatprep.subr.bf16.mxu1 %v2056_v51  ;;  %v2245_v1 = vpop.eup %2244 }
 0x615   :  { %2059 = vmatpush3.bf16.msra.mxu1 %v2056_v51  ;;  %1922 = vmatprep.mubr.msk.f32.mxu1 %vm84_vm0, %v611_v58  ;;  %v613_v7 = vmul.f32 %v2245_v1, %v2654_v29 }
 0x616   :  { %v2084_v63 = vpack.c.bf16 %v2192_v59, %v2191_v60  ;;  %v2060_v0 = vpack.c.bf16 %v2187_v61, %v2186_v62  ;;  %v2247_v4 = vpop.eup %2246 }
 0x617   :  { %v2195_v2 = vpop.permute.xlu1 %2194  ;;  %v1293_v3 = vpop.permute.xlu0 %1292  ;;  %v615_v16 = vmul.f32 %v2247_v4, %v2659_v35 }
 0x618   :  { %v2197_v5 = vunpack.i.h.bf16 %v2195_v2  ;;  %v2196_v6 = vunpack.i.l.bf16 %v2195_v2  ;;  %2061 = vmatprep.subr.bf16.mxu1 %v2060_v0  ;;  %2086 = vmatprep.subr.msk.bf16.mxu0 %vm2548_vm2, %v2084_v63 }
 0x619   :  { %1988 = vmatprep.mubr.msk.f32.mxu0 %vm202_vm1, %v1293_v3  ;;  %2063 = vmatpush3.bf16.msra.mxu1 %v2060_v0 }
 0x61a   :  { %v2090_v8 = vpack.c.bf16 %v2197_v5, %v2196_v6  ;;  %2089 = vmatpush3.bf16.xpose.msk.msra.mxu0 %vm2548_vm2, %v2084_v63  ;;  %v2249_v9 = vpop.eup %2248  ;;  %1928 = vmatprep.subr.mxu1 %v187_v13 }
 0x61b   :  { %v617_v17 = vmul.f32 %v2249_v9, %v2663_v37  ;;  %v1295_v18 = vpop.permute.xlu1 %1294  ;;  %v1297_v20 = vpop.permute.xlu0 %1296 }
 0x61c   :  { %1923 = vmatmul.mubr.msk.f32.vlgmr.msra.gmra.mrb[4].mxu1 %vm84_vm0, %v613_v7  ;;  %2092 = vmatprep.subr.msk.bf16.mxu0 %vm2548_vm2, %v2090_v8 }
 0x61d   :  { %1925 = vmatprep.mubr.msk.f32.mxu1 %vm84_vm0, %v615_v16  ;;  %1929 = vmatpush3.msra.mxu1 %v187_v13 }
 0x61e   :  { %1936 = vmatprep.subr.mxu1 %v186_v14 }
 0x61f   :  { %v1299_v21 = vpop.permute.xlu1 %1298 }
 0x620   :  { %1926 = vmatmul.mubr.msk.f32.gmra.mrb[6].mxu1 %vm84_vm0, %v617_v17 }
 0x622   :  { %2095 = vmatpush3.bf16.xpose.msk.msra.mxu0 %vm2548_vm2, %v2090_v8 }
 0x629   :  { %1989 = vmatmul.mubr.msk.f32.vlgmr.msra.gmra.mrb[16].mxu0 %vm202_vm1, %v1295_v18 }
 0x62a   :  { %1991 = vmatprep.mubr.msk.f32.mxu0 %vm202_vm1, %v1297_v20 }
 0x62d   :  { %1992 = vmatmul.mubr.msk.f32.gmra.mrb[18].mxu0 %vm202_vm1, %v1299_v21 }
 0x64c   :  { %v1040_v22 = vpop.xlane.xlu0 %1039 }
 0x64d   :  { %v1050_v23 = vsub.f32 %v2676_v39, %v1040_v22 }
 0x64f   :  { %v1054_v24 = vmul.f32 1.442695, %v1050_v23 }
 0x650   :  { %v1043_v26 = vpop.xlane.xlu1 %1042  ;;  %v1046_v28 = vpop.xlane.xlu0 %1045 }
 0x651   :  { %2250 = vpow2.f32 %v1054_v24  ;;  %v1051_v29 = vsub.f32 %v2679_v40, %v1043_v26  ;;  %v1052_v19 = vsub.f32 %v2682_v41, %v1046_v28 }
 0x653   :  { %v1056_v30 = vmul.f32 1.442695, %v1051_v29  ;;  %v1058_v31 = vmul.f32 1.442695, %v1052_v19 }
 0x654   :  { %v1049_v34 = vpop.xlane.xlu0 %1048 }
 0x655   :  { %2252 = vpow2.f32 %v1056_v30  ;;  %v1053_v35 = vsub.f32 %v2687_v10, %v1049_v34 }
 0x656   :  { %2254 = vpow2.f32 %v1058_v31 }
 0x657   :  { %v1060_v36 = vmul.f32 1.442695, %v1053_v35 }
 0x659   :  { %2256 = vpow2.f32 %v1060_v36 }
 0x65b   :  { %v2251_v37 = vpop.eup %2250 }
 0x65c   :  { %v1062_v38 = vsel %vm84_vm0, %v2251_v37, 0.0 }
 0x65d   :  { %1063 = vadd.xlane.f32.xlu1 %v1062_v38 }
 0x65f   :  { %v2253_v39 = vpop.eup %2252 }
 0x660   :  { %v2719_v42 = vpop.eup %2254  ;;  %v1065_v40 = vsel %vm84_vm0, %v2253_v39, 0.0 }
 0x661   :  { %1066 = vadd.xlane.f32.xlu0 %v1065_v40  ;;  %v1068_v41 = vsel %vm84_vm0, %v2719_v42, 0.0 }
 0x662   :  { %1069 = vadd.xlane.f32.xlu1 %v1068_v41 }
 0x663   :  { %v2724_v11 = vpop.eup %2256 }
 0x664   :  { %v1071_v10 = vsel %vm84_vm0, %v2724_v11, 0.0 }
 0x665   :  { %1072 = vadd.xlane.f32.xlu0 %v1071_v10 }
 0x673   :  { %2199 = vrot.lane.b32.xlu1 %v2534_v12, %s2415_s25 }
 0x67b   :  { %2204 = vrot.lane.b32.xlu0 %v2543_v15, %s2415_s25 }
 0x6ea   :  { %v1064_v43 = vpop.xlane.xlu1 %1063 }
 0x6eb   :  { %2258 = vrcp.f32 %v1064_v43 }
 0x6ee   :  { %v1067_v44 = vpop.xlane.xlu0 %1066 }
 0x6ef   :  { %v1070_v45 = vpop.xlane.xlu1 %1069  ;;  %v1924_v46 = vpop.f32.mrb[4].mxu1  ;;  %2260 = vrcp.f32 %v1067_v44 }
 0x6f0   :  { %v708_v47 = vpop.f32.mrb[5].mxu1  ;;  %2262 = vrcp.f32 %v1070_v45 }
 0x6f1   :  { %1930 = vmatprep.mubr.msk.f32.mxu1 %vm202_vm1, %v708_v47 }
 0x6f2   :  { %v1073_v48 = vpop.xlane.xlu0 %1072  ;;  %1931 = vmatmul.mubr.msk.f32.vlgmr.msra.gmra.mrb[8].mxu1 %vm202_vm1, %v1924_v46 }
 0x6f3   :  { %v2200_v49 = vpop.permute.xlu1 %2199  ;;  %v1927_v50 = vpop.f32.mrb[6].mxu1  ;;  %1937 = vmatpush3.msra.mxu1 %v186_v14  ;;  %2264 = vrcp.f32 %v1073_v48 }
 0x6f4   :  { %v2202_v51 = vunpack.i.h.bf16 %v2200_v49  ;;  %v2201_v56 = vunpack.i.l.bf16 %v2200_v49  ;;  %v718_v57 = vpop.f32.mrb[7].mxu1 }
 0x6f5   :  { %1933 = vmatprep.mubr.msk.f32.mxu1 %vm202_vm1, %v718_v57  ;;  %v2259_v63 = vpop.eup %2258 }
 0x6f6   :  { %v2076_v58 = vpack.c.bf16 %v2202_v51, %v2201_v56  ;;  %v2205_v59 = vpop.permute.xlu0 %2204  ;;  %1934 = vmatmul.mubr.msk.f32.gmra.mrb[10].mxu1 %vm202_vm1, %v1927_v50  ;;  %v1075_v4 = vmul.f32 %v2259_v63, %v2251_v37 }
 0x6f7   :  { %v2207_v60 = vunpack.i.h.bf16 %v2205_v59  ;;  %v2206_v61 = vunpack.i.l.bf16 %v2205_v59  ;;  %1938 = vmatprep.mubr.msk.f32.mxu1 %vm202_vm1, %v2640_v53 }
 0x6f8   :  { %2077 = vmatprep.subr.bf16.mxu1 %v2076_v58 }
 0x6f9   :  { %v2080_v62 = vpack.c.bf16 %v2207_v60, %v2206_v61  ;;  %v2261_v1 = vpop.eup %2260 }
 0x6fa   :  { %1939 = vmatmul.mubr.msk.f32.vlgmr.msra.gmra.mrb[8].mxu1 %vm202_vm1, %v2638_v52  ;;  %v2263_v5 = vpop.eup %2262  ;;  %v1077_v6 = vmul.f32 %v2261_v1, %v2253_v39 }
 0x6fb   :  { %2079 = vmatpush3.bf16.msra.mxu1 %v2076_v58  ;;  %1941 = vmatprep.mubr.msk.f32.mxu1 %vm202_vm1, %v2644_v55 }
 0x6fc   :  { %2081 = vmatprep.subr.bf16.mxu1 %v2080_v62  ;;  %v1990_v0 = vpop.f32.mrb[16].mxu0 }
 0x6fd   :  { %v1396_v2 = vadd.f32 %v1990_v0, %v2566_v25  ;;  %v1390_v3 = vpop.f32.mrb[17].mxu0  ;;  %v2265_v8 = vpop.eup %2264 }
 0x6fe   :  { %v1391_v53 = vadd.f32 %v1390_v3, %v2568_v27  ;;  %1942 = vmatmul.mubr.msk.f32.gmra.mrb[10].mxu1 %vm202_vm1, %v2642_v54  ;;  %v1079_v27 = vmul.f32 %v2263_v5, %v2719_v42  ;;  %v1081_v18 = vmul.f32 %v2265_v8, %v2724_v11  ;;  %v1765_v5 = vld [vmem:[%s2799_s3] ss:$0 sm:$0xff]  ;;  %s2370_s3 = scalar_lea.vmem %s1684_s0, 512 }
 0x6ff   :  { %2083 = vmatpush3.bf16.msra.mxu1 %v2080_v62  ;;  %v1412_v52 = vsel %vm84_vm0, %v1396_v2, -inf  ;;  %1966 = vmatprep.mubr.msk.f32.mxu1 %vm84_vm0, %v1075_v4  ;;  %v189_v62 = vld [vmem:[#allocation7 + $0x18] sm:$0xff]  ;;  %p2371_p4 = scmp.ne.s32.totalorder %s1684_s0, %s2370_s3  ;;  %p2376_p6 = scmp.lt.s32.totalorder %s2370_s3, %s2370_s3 }
 0x700   :  { %v1993_v55 = vpop.f32.mrb[18].mxu0  ;;  %1413 = vmax.xlane.f32.xlu0 %v1412_v52  ;;  %v1409_v7 = vsel %vm84_vm0, %v1391_v53, -inf }
 0x701   :  { %v1406_v25 = vadd.f32 %v1993_v55, %v2575_v33  ;;  %v1400_v9 = vpop.f32.mrb[19].mxu0  ;;  %1410 = vmax.xlane.f32.xlu1 %v1409_v7  ;;  %v188_v33 = vld [vmem:[#allocation7 + $0x10] sm:$0xff]  ;;  %p2377_p7 = por %p2376_p6, %p2375_p5 }
 0x702   :  { %v1401_v16 = vadd.f32 %v1400_v9, %v2573_v32  ;;  %1967 = vmatmul.mubr.msk.f32.vlgmr.msra.gmra.mrb[12].mxu1 %vm84_vm0, %v1077_v6  ;;  %1972 = vmatprep.subr.mxu1 %v188_v33 }
 0x703   :  { %v1418_v54 = vsel %vm84_vm0, %v1406_v25, -inf  ;;  %1969 = vmatprep.mubr.msk.f32.mxu1 %vm84_vm0, %v1079_v27  ;;  %1973 = vmatpush3.msra.mxu1 %v188_v33  ;;  %p2378_p8 = pnand %p2377_p7, %p2371_p4 }
 0x704   :  { %1419 = vmax.xlane.f32.xlu0 %v1418_v54  ;;  %v1415_v17 = vsel %vm84_vm0, %v1401_v16, -inf }
 0x705   :  { %1416 = vmax.xlane.f32.xlu1 %v1415_v17 }
 0x706   :  { %1970 = vmatmul.mubr.msk.f32.gmra.mrb[14].mxu1 %vm84_vm0, %v1081_v18 }
 0x78d   :  { %v1414_v20 = vpop.xlane.xlu0 %1413 }
 0x78e   :  { %v1422_v21 = vsub.f32 %v1396_v2, %v1414_v20  ;;  %v1411_v32 = vpop.xlane.xlu1 %1410 }
 0x78f   :  { %v1421_v22 = vsub.f32 %v1391_v53, %v1411_v32 }
 0x790   :  { %v1427_v23 = vmul.f32 1.442695, %v1422_v21 }
 0x791   :  { %v1425_v24 = vmul.f32 1.442695, %v1421_v22  ;;  %v1420_v26 = vpop.xlane.xlu0 %1419 }
 0x792   :  { %2266 = vpow2.f32 %v1427_v23  ;;  %v1424_v28 = vsub.f32 %v1406_v25, %v1420_v26  ;;  %v1417_v29 = vpop.xlane.xlu1 %1416 }
 0x793   :  { %2268 = vpow2.f32 %v1425_v24  ;;  %v1423_v19 = vsub.f32 %v1401_v16, %v1417_v29 }
 0x794   :  { %v1431_v30 = vmul.f32 1.442695, %v1424_v28 }
 0x795   :  { %v1429_v31 = vmul.f32 1.442695, %v1423_v19 }
 0x796   :  { %2270 = vpow2.f32 %v1431_v30 }
 0x797   :  { %2272 = vpow2.f32 %v1429_v31 }
 0x79c   :  { %v2267_v34 = vpop.eup %2266 }
 0x79d   :  { %v2269_v35 = vpop.eup %2268  ;;  %v1436_v36 = vsel %vm84_vm0, %v2267_v34, 0.0 }
 0x79e   :  { %1437 = vadd.xlane.f32.xlu0 %v1436_v36  ;;  %v1433_v37 = vsel %vm84_vm0, %v2269_v35, 0.0 }
 0x79f   :  { %1434 = vadd.xlane.f32.xlu1 %v1433_v37 }
 0x7a0   :  { %v2271_v38 = vpop.eup %2270 }
 0x7a1   :  { %v2273_v39 = vpop.eup %2272  ;;  %v1442_v42 = vsel %vm84_vm0, %v2271_v38, 0.0 }
 0x7a2   :  { %1443 = vadd.xlane.f32.xlu0 %v1442_v42  ;;  %v1439_v40 = vsel %vm84_vm0, %v2273_v39, 0.0 }
 0x7a3   :  { %1440 = vadd.xlane.f32.xlu1 %v1439_v40 }
 0x7b4   :  { %2209 = vrot.lane.b32.xlu1 %v2534_v12, %s2416_s26 }
 0x7b8   :  { %2214 = vrot.lane.b32.xlu0 %v2543_v15, %s2416_s26 }
 0x7d5   :  { %v1968_v41 = vpop.f32.mrb[12].mxu1 }
 0x7d6   :  { %v1172_v11 = vpop.f32.mrb[13].mxu1 }
 0x7d7   :  { %1974 = vmatprep.mubr.msk.f32.mxu1 %vm202_vm1, %v1172_v11 }
 0x7d8   :  { %1975 = vmatmul.mubr.msk.f32.vlgmr.msra.gmra.mrb[8].mxu1 %vm202_vm1, %v1968_v41 }
 0x7d9   :  { %v1971_v10 = vpop.f32.mrb[14].mxu1 }
 0x7da   :  { %v1182_v13 = vpop.f32.mrb[15].mxu1 }
 0x7db   :  { %1977 = vmatprep.mubr.msk.f32.mxu1 %vm202_vm1, %v1182_v13 }
 0x7dc   :  { %1978 = vmatmul.mubr.msk.f32.gmra.mrb[10].mxu1 %vm202_vm1, %v1971_v10 }
 0x82b   :  { %v1438_v14 = vpop.xlane.xlu0 %1437 }
 0x82c   :  { %v1435_v43 = vpop.xlane.xlu1 %1434 }
 0x82d   :  { %2274 = vrcp.f32 %v1435_v43 }
 0x82e   :  { %2276 = vrcp.f32 %v1438_v14 }
 0x82f   :  { %v1444_v44 = vpop.xlane.xlu0 %1443 }
 0x830   :  { %v1441_v12 = vpop.xlane.xlu1 %1440 }
 0x831   :  { %2278 = vrcp.f32 %v1441_v12 }
 0x832   :  { %2280 = vrcp.f32 %v1444_v44 }
 0x833   :  { %v2215_v15 = vpop.permute.xlu0 %2214 }
 0x834   :  { %v2210_v45 = vpop.permute.xlu1 %2209  ;;  %v2217_v46 = vunpack.i.h.bf16 %v2215_v15  ;;  %v2216_v47 = vunpack.i.l.bf16 %v2215_v15 }
 0x835   :  { %v2212_v48 = vunpack.i.h.bf16 %v2210_v45  ;;  %v2211_v49 = vunpack.i.l.bf16 %v2210_v45 }
 0x836   :  { %v2100_v57 = vpack.c.bf16 %v2217_v46, %v2216_v47 }
 0x837   :  { %v2275_v50 = vpop.eup %2274  ;;  %v2096_v51 = vpack.c.bf16 %v2212_v48, %v2211_v49 }
 0x838   :  { %v1446_v56 = vmul.f32 %v2275_v50, %v2269_v35  ;;  %v2277_v58 = vpop.eup %2276 }
 0x839   :  { %2097 = vmatprep.subr.bf16.mxu0 %v2096_v51  ;;  %2104 = vmatprep.subr.bf16.mxu1 %v2096_v51  ;;  %v1448_v63 = vmul.f32 %v2277_v58, %v2267_v34 }
 0x83a   :  { %2099 = vmatpush3.bf16.msra.mxu0 %v2096_v51  ;;  %2106 = vmatpush3.bf16.msra.mxu1 %v2096_v51 }
 0x83b   :  { %v2279_v59 = vpop.eup %2278  ;;  %2002 = vmatprep.mubr.msk.f32.mxu0 %vm84_vm0, %v1446_v56  ;;  %2101 = vmatprep.subr.bf16.mxu0 %v2100_v57 }
 0x83c   :  { %v2281_v60 = vpop.eup %2280  ;;  %2105 = vmatprep.subr.bf16.mxu1 %v2100_v57  ;;  %v1450_v61 = vmul.f32 %v2279_v59, %v2273_v39 }
 0x83d   :  { %v1452_v0 = vmul.f32 %v2281_v60, %v2271_v38 }
 0x83e   :  { %2103 = vmatpush3.bf16.msra.mxu0 %v2100_v57  ;;  %2107 = vmatpush3.bf16.msra.mxu1 %v2100_v57 }
 0x83f   :  { %2005 = vmatprep.mubr.msk.f32.mxu1 %vm84_vm0, %v1450_v61  ;;  %2008 = vmatprep.subr.mxu1 %v189_v62 }
 0x841   :  { %2003 = vmatmul.mubr.msk.f32.vlgmr.msra.gmra.mrb[20].mxu0 %vm84_vm0, %v1448_v63  ;;  %2006 = vmatmul.mubr.msk.f32.vlgmr.msra.gmra.mrb[16].mxu1 %vm84_vm0, %v1452_v0 }
 0x842   :  { %2009 = vmatpush3.msra.mxu1 %v189_v62 }
 0x914   :  { %v2004_v1 = vpop.f32.mrb[20].mxu0  ;;  %v2007_v2 = vpop.f32.mrb[16].mxu1 }
 0x915   :  { %v1543_v3 = vpop.f32.mrb[21].mxu0  ;;  %v1553_v4 = vpop.f32.mrb[17].mxu1 }
 0x916   :  { %2010 = vmatprep.mubr.msk.f32.mxu1 %vm202_vm1, %v1543_v3 }
 0x917   :  { %2011 = vmatmul.mubr.msk.f32.vlgmr.msra.gmra.mrb[8].mxu1 %vm202_vm1, %v2004_v1 }
 0x918   :  { %2013 = vmatprep.mubr.msk.f32.mxu1 %vm202_vm1, %v1553_v4 }
 0x91b   :  { %2014 = vmatmul.mubr.msk.f32.gmra.mrb[10].mxu1 %vm202_vm1, %v2007_v2 }
 0x9ea   :  { %v2012_v53 = vpop.f32.mrb[8].mxu1 }
 0x9eb   :  { %v1671_v52 = vadd.f32 %v2012_v53, %v1765_v5  ;;  %v1640_v6 = vpop.f32.mrb[9].mxu1 }
 0x9ec   :  { %v1670_v55 = vadd.f32 %v1765_v5, %v1640_v6 }
 0x9ed   :  { %1675 = vst.msk [vmem:[#allocation10 + $0x8] sm:$0xff] %vm84_vm0, %v1671_v52 }
 0x9ee   :  { %1674 = vst.msk [vmem:[#allocation10] sm:$0xff] %vm84_vm0, %v1670_v55  ;;  %v2015_v7 = vpop.f32.mrb[10].mxu1 }
 0x9ef   :  { %v1673_v8 = vadd.f32 %v2015_v7, %v1765_v5  ;;  %v1650_v25 = vpop.f32.mrb[11].mxu1 }
 0x9f0   :  { %v1672_v9 = vadd.f32 %v1765_v5, %v1650_v25 }
 0x9f1   :  { %1677 = vst.msk [vmem:[#allocation10 + $0x18] sm:$0xff] %vm84_vm0, %v1673_v8 }
 0x9f2   :  { %1676 = vst.msk [vmem:[#allocation10 + $0x10] sm:$0xff] %vm84_vm0, %v1672_v9 }
 0x9f3   :  { %2381 = shalt.err (!%p2378_p8)
}
 0x9f4   :  { %s2382_s8 = scalar_lea.hbm %s2801_s5, 512 }
 0x9f5   :  { %p2383_p9 = scmp.ne.s32.totalorder %s2801_s5, %s2382_s8  ;;  %p2386_p10 = scmp.lt.u32.totalorder %s2382_s8, %s2801_s5 }
 0x9f7   :  { %p2388_p11 = pnand %p2386_p10, %p2383_p9 }
 0x9f9   :  { %2391 = shalt.err (!%p2388_p11)
}
 0x9fa   :  { %1689 = dma.vmem_to_hbm [thread:$0]  %s1684_s0, 512, %s2801_s5, [#allocation4], %s2402_s30, %s2402_s30, %s2403_s6  }
 0x9fb   :  { %2398 = dma.done.wait [#allocation4], 512  }
 0x9fc   :  { %2399 = vsyncadd [#allocation4], 4294966784 }
 0x9fd   :  { %1693 = vsyncpa [#allocation3], 1 }
 0x9fe   :  { %1694 = vsyncpa [#allocation6], 1 }
 0x9ff   :  { %1695 = vsyncpa [#allocation9], 1 }
 0xa00   :  { %1696 = vsyncpa [#allocation4], 1 }

</bundles_post_ra>
